<compile_context>
chip_gen: v6e
topology: v6e:2x2x1
jax: 0.10.0
libtpu: 0.0.40
codegen_flags: <defaults>
</compile_context>

<pallas_src>
import jax
import jax.numpy as jnp
from jax.experimental import pallas as pl
from jax.experimental.pallas import tpu as pltpu


def _homo_agg_kernel(feat_ref, neigh_ref, wp_ref, w_ref, wpsel_ref, sel_ref,
                     expand_ref, sel2_ref, out_ref):
    # feat_ref  : (BM, C)        node features
    # neigh_ref : (BM, S*C)      lane-dense neighbor features (s-major, c-minor)
    # wp_ref    : (BM, F)        raw weight_p
    # w_ref     : (C + S*C, S*F) rows [0:C] = block-diag(weight_cat[:E]) tiled over s
    #                            rows [C: ] = block-diag over (s, facet) of weight_cat[E:]
    # wpsel_ref : (F, S*F)       weight_p broadcast selector  wpsel[f', s*F+f] = (f'==f)
    # sel_ref   : (S*F, S)       facet-sum selector           sel[s'*F+f, s]   = (s'==s)
    # expand_ref: (S, S*C)       p broadcast selector         expand[s', s*C+c]= (s'==s)
    # sel2_ref  : (S*C, C)       neighbor-sum selector        sel2[s*C+c', c]  = (c'==c)
    # out_ref   : (BM, C)
    C = feat_ref.shape[-1]
    SC = neigh_ref.shape[-1]

    feat = feat_ref[...]              # (BM, C)
    neigh = neigh_ref[...]            # (BM, S*C)
    wp = wp_ref[...]                  # (BM, F)

    w_feat = w_ref[pl.ds(0, C), :]    # (C,   S*F)
    w_neigh = w_ref[pl.ds(C, SC), :]  # (S*C, S*F)

    # per-(neighbor, facet) score: relu( feat . wc1_facet + neigh . wc2_facet )
    score = jnp.dot(feat, w_feat, preferred_element_type=jnp.float32)
    score = score + jnp.dot(neigh, w_neigh, preferred_element_type=jnp.float32)
    score = jnp.maximum(score, 0.0)                                    # (BM, S*F)

    # broadcast weight_p across neighbors (tiny MXU matmul) and reduce facets
    wpt = jnp.dot(wp, wpsel_ref[...],
                  preferred_element_type=jnp.float32)                  # (BM, S*F)
    p = jnp.dot(score * wpt, sel_ref[...],
                preferred_element_type=jnp.float32)                    # (BM, S)

    # stable softmax over the neighbor (lane) axis
    p_max = jnp.max(p, axis=1, keepdims=True)
    e = jnp.exp(p - p_max)
    denom = jnp.sum(e, axis=1, keepdims=True)
    p = e * pl.reciprocal(denom, approx=True)                          # (BM, S)
    # dropout: identity in eval mode (see TODO above)

    # weighted sum over neighbors:  out[b, c] = sum_s p[b, s] * neigh[b, s, c]
    p_exp = jnp.dot(p, expand_ref[...],
                    preferred_element_type=jnp.float32)                # (BM, S*C)
    out = jnp.dot(p_exp * neigh, sel2_ref[...],
                  preferred_element_type=jnp.float32)                  # (BM, C)
    out_ref[...] = jnp.maximum(out, 0.0)


def _round_up(x, m):
    return ((x + m - 1) // m) * m


def _pick_block_m(M, target):
    bm = min(target, _round_up(M, 8))
    # Prefer >= 2 grid steps when there is enough work (keeps both v7x
    # TensorCores busy); a single step is fine for tiny M / single-TC chips.
    if M >= 16 and -(-M // bm) < 2:
        bm = _round_up(-(-M // 2), 8)
    return max(8, bm)


def homo_aggregate_attention(weight_p, feature, neigh_feature, weight_cat,
                             n_facet, block_m=256):
    """Pallas implementation of HomoAggregate_attention.forward (eval mode)."""
    B, N, S, C = neigh_feature.shape
    F = n_facet
    E = C // F
    M = B * N
    SF = S * F
    SC = S * C
    f32 = jnp.float32

    # ---- constant weight / selector matrices (pure layout plumbing) ----------
    wc1 = weight_cat[:E].astype(f32)
    wc2 = weight_cat[E:].astype(f32)
    eyeF = jnp.eye(F, dtype=f32)
    eyeS = jnp.eye(S, dtype=f32)
    eyeC = jnp.eye(C, dtype=f32)
    # block-diagonal (C, F):  W[f*E + e, g] = wc[e] if f == g else 0
    w1 = (eyeF[:, None, :] * wc1[None, :, None]).reshape(C, F)
    w2b = (eyeF[:, None, :] * wc2[None, :, None]).reshape(C, F)
    w1t = jnp.tile(w1, (1, S))                                         # (C, S*F)
    w2 = (eyeS[:, None, :, None] * w2b[None, :, None, :]).reshape(SC, SF)
    w_all = jnp.concatenate([w1t, w2], axis=0)                         # (C+S*C, S*F)
    wpsel = jnp.tile(eyeF, (1, S))                                     # (F, S*F)
    sel = jnp.repeat(eyeS, F, axis=0)                                  # (S*F, S)
    expand = jnp.repeat(eyeS, C, axis=1)                               # (S, S*C)
    sel2 = jnp.tile(eyeC, (S, 1))                                      # (S*C, C)

    # ---- flatten node axis, make neigh lane-dense (free row-major views) -----
    feat_r = feature.reshape(M, C).astype(f32)
    neigh_r = neigh_feature.reshape(M, SC).astype(f32)                 # lane-dense
    wp_r = weight_p.reshape(M, F).astype(f32)                          # raw (M, F)

    BM = _pick_block_m(M, block_m)
    Mp = _round_up(M, BM)
    if Mp != M:
        pad = Mp - M
        feat_r = jnp.pad(feat_r, ((0, pad), (0, 0)))
        neigh_r = jnp.pad(neigh_r, ((0, pad), (0, 0)))
        wp_r = jnp.pad(wp_r, ((0, pad), (0, 0)))

    grid = (Mp // BM,)

    flops = 2 * Mp * (C * SF + SC * SF + F * SF + SF * S + S * SC + SC * C)
    bytes_accessed = 4 * (Mp * (C + SC + F + C)
                          + (C + SC) * SF + F * SF + SF * S + S * SC + SC * C)
    cost = pl.CostEstimate(flops=flops, transcendentals=Mp * S,
                           bytes_accessed=bytes_accessed)

    out = pl.pallas_call(
        _homo_agg_kernel,
        out_shape=jax.ShapeDtypeStruct((Mp, C), f32),
        grid_spec=pltpu.PrefetchScalarGridSpec(
            num_scalar_prefetch=0,
            grid=grid,
            in_specs=[
                pl.BlockSpec((BM, C), lambda i: (i, 0)),       # feat
                pl.BlockSpec((BM, SC), lambda i: (i, 0)),      # neigh (lane-dense)
                pl.BlockSpec((BM, F), lambda i: (i, 0)),       # weight_p (raw)
                pl.BlockSpec((C + SC, SF), lambda i: (0, 0)),  # merged weight_cat
                pl.BlockSpec((F, SF), lambda i: (0, 0)),       # weight_p broadcast sel
                pl.BlockSpec((SF, S), lambda i: (0, 0)),       # facet-sum selector
                pl.BlockSpec((S, SC), lambda i: (0, 0)),       # p-broadcast selector
                pl.BlockSpec((SC, C), lambda i: (0, 0)),       # neighbor-sum selector
            ],
            out_specs=pl.BlockSpec((BM, C), lambda i: (i, 0)),
        ),
        compiler_params=pltpu.CompilerParams(
            dimension_semantics=("parallel",)),
        cost_estimate=cost,
    )(feat_r, neigh_r, wp_r, w_all, wpsel, sel, expand, sel2)

    return out[:M].reshape(B, N, C)


def reference(weight_p, feature, neigh_feature, weight_cat, n_facet):
    """Pure-JAX transcription of the PyTorch forward (eval-mode dropout)."""
    B, N, S, C = neigh_feature.shape
    F = n_facet
    E = C // F
    feat = feature.reshape(B, N, 1, F, E)
    nf = neigh_feature.reshape(B, N, S, F, E)
    feat_b = jnp.broadcast_to(feat, (B, N, S, F, E))
    cat = jnp.concatenate([feat_b, nf], axis=4)
    p = jnp.maximum(jnp.sum(cat * weight_cat.reshape(1, 1, 1, 1, 2 * E), axis=4), 0.0)
    p = jnp.sum(p * weight_p.reshape(B, N, 1, F), axis=3)
    p = jax.nn.softmax(p, axis=2)
    out = jnp.maximum(
        jnp.sum(neigh_feature.reshape(B, N, S, C) * p[..., None], axis=2), 0.0)
    return out


if __name__ == "__main__":
    # Module config: cur_dim=32, n_facet=4 -> emb_dim=8; dropout inactive (eval).
    cur_dim, n_facet = 32, 4
    emb_dim = cur_dim // n_facet
    B, N, S = 2, 4, 8   # batch_size, n_with_neg, neigh_size

    key = jax.random.PRNGKey(0)
    k_wc, k_wp, k_f, k_nf = jax.random.split(key, 4)
    weight_cat = jax.random.normal(k_wc, (2 * emb_dim,), dtype=jnp.float32)
    weight_p = jax.random.normal(k_wp, (B, N, n_facet), dtype=jnp.float32)
    feature = jax.random.normal(k_f, (B, N, cur_dim), dtype=jnp.float32)
    neigh_feature = jax.random.normal(k_nf, (B, N, S, cur_dim), dtype=jnp.float32)

    out = homo_aggregate_attention(weight_p, feature, neigh_feature,
                                   weight_cat, n_facet)
    out = jax.block_until_ready(out)

    ref = reference(weight_p, feature, neigh_feature, weight_cat, n_facet)
    assert out.shape == (B, N, cur_dim)
    # tolerance relaxed vs 1e-5 because the softmax denominator uses
    # pl.reciprocal(approx=True) (~2^-12 relative accuracy)
    assert jnp.allclose(out, ref, rtol=5e-3, atol=5e-3), "mismatch vs reference"
    print("KERNEL_OK")
</pallas_src>

<mosaic_0001>
module attributes {stable_mosaic.version = 11 : i64} {
  func.func @_homo_agg_kernel(%arg0: i32, %arg1: memref<8x32xf32, #tpu.memory_space<vmem>>, %arg2: memref<8x256xf32, #tpu.memory_space<vmem>>, %arg3: memref<8x4xf32, #tpu.memory_space<vmem>>, %arg4: memref<288x32xf32, #tpu.memory_space<vmem>>, %arg5: memref<4x32xf32, #tpu.memory_space<vmem>>, %arg6: memref<32x8xf32, #tpu.memory_space<vmem>>, %arg7: memref<8x256xf32, #tpu.memory_space<vmem>>, %arg8: memref<256x32xf32, #tpu.memory_space<vmem>>, %arg9: memref<8x32xf32, #tpu.memory_space<vmem>>) attributes {dimension_semantics = [#tpu.dimension_semantics<parallel>], iteration_bounds = array<i64: 1>, scalar_prefetch = 0 : i64, scratch_operands = 0 : i64, tpu.core_type = #tpu.core_type<tc>, window_params = [{transform_indices = @transform_0, window_bounds = array<i64: 8, 32>}, {transform_indices = @transform_1, window_bounds = array<i64: 8, 256>}, {transform_indices = @transform_2, window_bounds = array<i64: 8, 4>}, {pipeline_mode = #tpu.pipeline_mode<synchronous>, transform_indices = @transform_3, window_bounds = array<i64: 288, 32>}, {pipeline_mode = #tpu.pipeline_mode<synchronous>, transform_indices = @transform_4, window_bounds = array<i64: 4, 32>}, {pipeline_mode = #tpu.pipeline_mode<synchronous>, transform_indices = @transform_5, window_bounds = array<i64: 32, 8>}, {pipeline_mode = #tpu.pipeline_mode<synchronous>, transform_indices = @transform_6, window_bounds = array<i64: 8, 256>}, {pipeline_mode = #tpu.pipeline_mode<synchronous>, transform_indices = @transform_7, window_bounds = array<i64: 256, 32>}, {transform_indices = @transform_8, window_bounds = array<i64: 8, 32>}]} {
    %c0 = arith.constant 0 : index
    %c0_0 = arith.constant 0 : index
    %0 = vector.load %arg1[%c0, %c0_0] : memref<8x32xf32, #tpu.memory_space<vmem>>, vector<8x32xf32>
    %c0_1 = arith.constant 0 : index
    %c0_2 = arith.constant 0 : index
    %1 = vector.load %arg2[%c0_1, %c0_2] : memref<8x256xf32, #tpu.memory_space<vmem>>, vector<8x256xf32>
    %c0_3 = arith.constant 0 : index
    %c0_4 = arith.constant 0 : index
    %2 = vector.load %arg3[%c0_3, %c0_4] : memref<8x4xf32, #tpu.memory_space<vmem>>, vector<8x4xf32>
    %c0_5 = arith.constant 0 : index
    %c0_6 = arith.constant 0 : index
    %3 = vector.load %arg4[%c0_5, %c0_6] : memref<288x32xf32, #tpu.memory_space<vmem>>, vector<32x32xf32>
    %c32 = arith.constant 32 : index
    %c0_7 = arith.constant 0 : index
    %4 = vector.load %arg4[%c32, %c0_7] : memref<288x32xf32, #tpu.memory_space<vmem>>, vector<256x32xf32>
    %cst = arith.constant dense<0.000000e+00> : vector<8x32xf32>
    %5 = tpu.matmul %0, %3, %cst {dimension_numbers = #tpu.dot_dimension_numbers<[1], [0], [0], [1], [0, 0, 1, 1], [], []>} : vector<8x32xf32>, vector<32x32xf32>, vector<8x32xf32> -> vector<8x32xf32>
    %cst_8 = arith.constant dense<0.000000e+00> : vector<8x32xf32>
    %6 = tpu.matmul %1, %4, %cst_8 {dimension_numbers = #tpu.dot_dimension_numbers<[1], [0], [0], [1], [0, 0, 1, 1], [], []>} : vector<8x256xf32>, vector<256x32xf32>, vector<8x32xf32> -> vector<8x32xf32>
    %7 = arith.addf %5, %6 : vector<8x32xf32>
    %cst_9 = arith.constant 0.000000e+00 : f32
    %8 = vector.broadcast %cst_9 : f32 to vector<8x32xf32>
    %9 = arith.maximumf %7, %8 : vector<8x32xf32>
    %c0_10 = arith.constant 0 : index
    %c0_11 = arith.constant 0 : index
    %10 = vector.load %arg5[%c0_10, %c0_11] : memref<4x32xf32, #tpu.memory_space<vmem>>, vector<4x32xf32>
    %cst_12 = arith.constant dense<0.000000e+00> : vector<8x32xf32>
    %11 = tpu.matmul %2, %10, %cst_12 {dimension_numbers = #tpu.dot_dimension_numbers<[1], [0], [0], [1], [0, 0, 1, 1], [], []>} : vector<8x4xf32>, vector<4x32xf32>, vector<8x32xf32> -> vector<8x32xf32>
    %12 = arith.mulf %9, %11 : vector<8x32xf32>
    %c0_13 = arith.constant 0 : index
    %c0_14 = arith.constant 0 : index
    %13 = vector.load %arg6[%c0_13, %c0_14] : memref<32x8xf32, #tpu.memory_space<vmem>>, vector<32x8xf32>
    %cst_15 = arith.constant dense<0.000000e+00> : vector<8x8xf32>
    %14 = tpu.matmul %12, %13, %cst_15 {dimension_numbers = #tpu.dot_dimension_numbers<[1], [0], [0], [1], [0, 0, 1, 1], [], []>} : vector<8x32xf32>, vector<32x8xf32>, vector<8x8xf32> -> vector<8x8xf32>
    %cst_16 = arith.constant dense<0xFF800000> : vector<8xf32>
    %15 = vector.multi_reduction <maximumf>, %14, %cst_16 [1] : vector<8x8xf32> to vector<8xf32>
    %16 = vector.shape_cast %15 : vector<8xf32> to vector<8x1xf32>
    %17 = vector.broadcast %16 : vector<8x1xf32> to vector<8x8xf32>
    %18 = arith.subf %14, %17 : vector<8x8xf32>
    %19 = math.exp %18 : vector<8x8xf32>
    %cst_17 = arith.constant dense<0.000000e+00> : vector<8xf32>
    %20 = vector.multi_reduction <add>, %19, %cst_17 [1] : vector<8x8xf32> to vector<8xf32>
    %21 = vector.shape_cast %20 : vector<8xf32> to vector<8x1xf32>
    %22 = tpu.reciprocal %21 {approx = true} : vector<8x1xf32> -> vector<8x1xf32>
    %23 = vector.broadcast %22 : vector<8x1xf32> to vector<8x8xf32>
    %24 = arith.mulf %19, %23 : vector<8x8xf32>
    %c0_18 = arith.constant 0 : index
    %c0_19 = arith.constant 0 : index
    %25 = vector.load %arg7[%c0_18, %c0_19] : memref<8x256xf32, #tpu.memory_space<vmem>>, vector<8x256xf32>
    %cst_20 = arith.constant dense<0.000000e+00> : vector<8x256xf32>
    %26 = tpu.matmul %24, %25, %cst_20 {dimension_numbers = #tpu.dot_dimension_numbers<[1], [0], [0], [1], [0, 0, 1, 1], [], []>} : vector<8x8xf32>, vector<8x256xf32>, vector<8x256xf32> -> vector<8x256xf32>
    %27 = arith.mulf %26, %1 : vector<8x256xf32>
    %c0_21 = arith.constant 0 : index
    %c0_22 = arith.constant 0 : index
    %28 = vector.load %arg8[%c0_21, %c0_22] : memref<256x32xf32, #tpu.memory_space<vmem>>, vector<256x32xf32>
    %cst_23 = arith.constant dense<0.000000e+00> : vector<8x32xf32>
    %29 = tpu.matmul %27, %28, %cst_23 {dimension_numbers = #tpu.dot_dimension_numbers<[1], [0], [0], [1], [0, 0, 1, 1], [], []>} : vector<8x256xf32>, vector<256x32xf32>, vector<8x32xf32> -> vector<8x32xf32>
    %cst_24 = arith.constant 0.000000e+00 : f32
    %30 = vector.broadcast %cst_24 : f32 to vector<8x32xf32>
    %31 = arith.maximumf %29, %30 : vector<8x32xf32>
    %c0_25 = arith.constant 0 : index
    %c0_26 = arith.constant 0 : index
    %32 = vector.load %arg9[%c0_25, %c0_26] : memref<8x32xf32, #tpu.memory_space<vmem>>, vector<8x32xf32>
    tpu.vector_store %arg9[%c0_25, %c0_26], %31 {strides = array<i32>} : memref<8x32xf32, #tpu.memory_space<vmem>>, vector<8x32xf32>,
    return
  }
  func.func @transform_0(%arg0: i32) -> (i32, i32) {
    %c0_i32 = arith.constant 0 : i32
    %c0_i32_0 = arith.constant 0 : i32
    return %arg0, %c0_i32 : i32, i32
  }
  func.func @transform_1(%arg0: i32) -> (i32, i32) {
    %c0_i32 = arith.constant 0 : i32
    %c0_i32_0 = arith.constant 0 : i32
    return %arg0, %c0_i32 : i32, i32
  }
  func.func @transform_2(%arg0: i32) -> (i32, i32) {
    %c0_i32 = arith.constant 0 : i32
    %c0_i32_0 = arith.constant 0 : i32
    return %arg0, %c0_i32 : i32, i32
  }
  func.func @transform_3(%arg0: i32) -> (i32, i32) {
    %c0_i32 = arith.constant 0 : i32
    %c0_i32_0 = arith.constant 0 : i32
    %c0_i32_1 = arith.constant 0 : i32
    return %c0_i32, %c0_i32_0 : i32, i32
  }
  func.func @transform_4(%arg0: i32) -> (i32, i32) {
    %c0_i32 = arith.constant 0 : i32
    %c0_i32_0 = arith.constant 0 : i32
    %c0_i32_1 = arith.constant 0 : i32
    return %c0_i32, %c0_i32_0 : i32, i32
  }
  func.func @transform_5(%arg0: i32) -> (i32, i32) {
    %c0_i32 = arith.constant 0 : i32
    %c0_i32_0 = arith.constant 0 : i32
    %c0_i32_1 = arith.constant 0 : i32
    return %c0_i32, %c0_i32_0 : i32, i32
  }
  func.func @transform_6(%arg0: i32) -> (i32, i32) {
    %c0_i32 = arith.constant 0 : i32
    %c0_i32_0 = arith.constant 0 : i32
    %c0_i32_1 = arith.constant 0 : i32
    return %c0_i32, %c0_i32_0 : i32, i32
  }
  func.func @transform_7(%arg0: i32) -> (i32, i32) {
    %c0_i32 = arith.constant 0 : i32
    %c0_i32_0 = arith.constant 0 : i32
    %c0_i32_1 = arith.constant 0 : i32
    return %c0_i32, %c0_i32_0 : i32, i32
  }
  func.func @transform_8(%arg0: i32) -> (i32, i32) {
    %c0_i32 = arith.constant 0 : i32
    %c0_i32_0 = arith.constant 0 : i32
    return %arg0, %c0_i32 : i32, i32
  }
}

</mosaic_0001>

<bundles_post_ra>
// kernel: tpu_custom_call.1
= control target key start
LH: loop header
LB: loop body
LE: loop exit
PB: predicated region body
PF: predicated region fallthrough
CT: control target
= control target key end

     0   :  { %v723_v4 = vmov 0.0   ;;  %vm724_vm0 = vmmov 0   ;;  %s1041_s0 = inlined_call_operand.vmem [shape: f32[8,32], index: 0, kind: input, shape index: {}]   ;;  %s1042_s1 = inlined_call_operand.vmem [shape: f32[8,256], index: 1, kind: input, shape index: {}]   ;;  %s1043_s2 = inlined_call_operand.vmem [shape: f32[8,4], index: 2, kind: input, shape index: {}]   ;;  %s1044_s3 = inlined_call_operand.vmem [shape: f32[288,32], index: 3, kind: input, shape index: {}]   ;;  %s1045_s4 = inlined_call_operand.vmem [shape: f32[4,32], index: 4, kind: input, shape index: {}]   ;;  %s1046_s5 = inlined_call_operand.vmem [shape: f32[32,8], index: 5, kind: input, shape index: {}]   ;;  %s1047_s6 = inlined_call_operand.vmem [shape: f32[8,256], index: 6, kind: input, shape index: {}]   ;;  %s1048_s7 = inlined_call_operand.vmem [shape: f32[256,32], index: 7, kind: input, shape index: {}]   ;;  %s1049_s8 = inlined_call_operand.hbm [shape: f32[8,32], index: 8, kind: output, shape index: {}]  }
   0x1   :  { %v69_v0 = vld [vmem:[%s1044_s3 + $0x118] sm:$0xff]  ;;  %v68_v2 = vld [vmem:[%s1044_s3 + $0x110] sm:$0xff]  ;;  %683 = vmatprep.subr.mxu1 %v723_v4  ;;  %v67_v5 = vld [vmem:[%s1044_s3 + $0x108] sm:$0xff]  ;;  %691 = vmatprep.mubr.msk.f32.mxu1 %vm724_vm0, %v723_v4 }
   0x2   :  { %v53_v1 = vld [vmem:[%s1044_s3 + $0x98] sm:$0xff]  ;;  %585 = vmatprep.subr.mxu0 %v69_v0  ;;  %v52_v3 = vld [vmem:[%s1044_s3 + $0x90] sm:$0xff]  ;;  %v51_v6 = vld [vmem:[%s1044_s3 + $0x88] sm:$0xff] }
   0x3   :  { %586 = vmatpush3.msra.mxu0 %v53_v1  ;;  %v66_v7 = vld [vmem:[%s1044_s3 + $0x100] sm:$0xff]  ;;  %v65_v9 = vld [vmem:[%s1044_s3 + $0xf8] sm:$0xff]  ;;  %v64_v11 = vld [vmem:[%s1044_s3 + $0xf0] sm:$0xff] }
   0x4   :  { %587 = vmatprep.subr.mxu0 %v68_v2  ;;  %v50_v8 = vld [vmem:[%s1044_s3 + $0x80] sm:$0xff]  ;;  %v49_v10 = vld [vmem:[%s1044_s3 + $0x78] sm:$0xff]  ;;  %v48_v12 = vld [vmem:[%s1044_s3 + $0x70] sm:$0xff] }
   0x5   :  { %588 = vmatpush3.msra.mxu0 %v52_v3  ;;  %v63_v13 = vld [vmem:[%s1044_s3 + $0xe8] sm:$0xff]  ;;  %v62_v16 = vld [vmem:[%s1044_s3 + $0xe0] sm:$0xff] }
   0x6   :  { %589 = vmatprep.subr.mxu0 %v67_v5  ;;  %v816_v14 = vld [vmem:[%s1042_s1 + $0x8] sm:$0xff]  ;;  %v46_v17 = vld [vmem:[%s1044_s3 + $0x60] sm:$0xff] }
   0x7   :  { %590 = vmatpush3.msra.mxu0 %v51_v6  ;;  %v47_v15 = vld [vmem:[%s1044_s3 + $0x68] sm:$0xff]  ;;  %134 = vmatprep.mubr.f32.mxu0 %v816_v14 }
   0x8   :  { %591 = vmatprep.subr.mxu0 %v66_v7 }
   0x9   :  { %592 = vmatpush3.msra.mxu0 %v50_v8 }
   0xa   :  { %593 = vmatprep.subr.mxu0 %v65_v9 }
   0xb   :  { %594 = vmatpush3.msra.mxu0 %v49_v10 }
   0xc   :  { %595 = vmatprep.subr.mxu0 %v64_v11 }
   0xd   :  { %596 = vmatpush3.msra.mxu0 %v48_v12 }
   0xe   :  { %597 = vmatprep.subr.mxu0 %v63_v13 }
   0xf   :  { %13 = vsyncpa [#allocation3], 0  ;;  %598 = vmatpush3.msra.mxu0 %v47_v15  ;;  %v61_v18 = vld [vmem:[%s1044_s3 + $0xd8] sm:$0xff]  ;;  %v60_v20 = vld [vmem:[%s1044_s3 + $0xd0] sm:$0xff]  ;;  %vm140_vm1 = vcmask 261120   ;;  %vm220_vm2 = vcmask 1043456  }
  0x10   :  { %599 = vmatprep.subr.mxu0 %v62_v16  ;;  %v45_v19 = vld [vmem:[%s1044_s3 + $0x58] sm:$0xff]  ;;  %v44_v21 = vld [vmem:[%s1044_s3 + $0x50] sm:$0xff]  ;;  %v59_v22 = vld [vmem:[%s1044_s3 + $0xc8] sm:$0xff]  ;;  %vm216_vm3 = vcmask 31744   ;;  %vm372_vm4 = vcmask 64512  }
  0x11   :  { %600 = vmatpush3.msra.mxu0 %v46_v17  ;;  %v43_v23 = vld [vmem:[%s1044_s3 + $0x48] sm:$0xff]  ;;  %v58_v24 = vld [vmem:[%s1044_s3 + $0xc0] sm:$0xff]  ;;  %v57_v26 = vld [vmem:[%s1044_s3 + $0xb8] sm:$0xff] }
  0x12   :  { %601 = vmatprep.subr.mxu0 %v61_v18  ;;  %v42_v25 = vld [vmem:[%s1044_s3 + $0x40] sm:$0xff]  ;;  %v41_v27 = vld [vmem:[%s1044_s3 + $0x38] sm:$0xff]  ;;  %v56_v28 = vld [vmem:[%s1044_s3 + $0xb0] sm:$0xff] }
  0x13   :  { %602 = vmatpush3.msra.mxu0 %v45_v19  ;;  %v40_v29 = vld [vmem:[%s1044_s3 + $0x30] sm:$0xff]  ;;  %v55_v30 = vld [vmem:[%s1044_s3 + $0xa8] sm:$0xff]  ;;  %v54_v32 = vld [vmem:[%s1044_s3 + $0xa0] sm:$0xff] }
  0x14   :  { %603 = vmatprep.subr.mxu0 %v60_v20  ;;  %v39_v31 = vld [vmem:[%s1044_s3 + $0x28] sm:$0xff]  ;;  %v38_v33 = vld [vmem:[%s1044_s3 + $0x20] sm:$0xff]  ;;  %v37_v35 = vld [vmem:[%s1044_s3 + $0x18] sm:$0xff] }
  0x15   :  { %604 = vmatpush3.msra.mxu0 %v44_v21  ;;  %v879_v34 = vld [vmem:[%s1042_s1] sm:$0xff]  ;;  %v36_v36 = vld [vmem:[%s1044_s3 + $0x10] sm:$0xff]  ;;  %v35_v37 = vld [vmem:[%s1044_s3 + $0x8] sm:$0xff] }
  0x16   :  { %605 = vmatprep.subr.mxu0 %v59_v22  ;;  %v34_v38 = vld [vmem:[%s1044_s3] sm:$0xff]  ;;  %v298_v42 = vld [vmem:[%s1046_s5 + $0x18] sm:$0xff]  ;;  %v297_v43 = vld [vmem:[%s1046_s5 + $0x10] sm:$0xff] }
  0x17   :  { %606 = vmatpush3.msra.mxu0 %v43_v23  ;;  %v30_v39 = vld [vmem:[%s1041_s0] sm:$0xff]  ;;  %684 = vmatpush3.msra.mxu1 %v298_v42  ;;  %v296_v44 = vld [vmem:[%s1046_s5 + $0x8] sm:$0xff]  ;;  %v493_v2 = vld [vmem:[%s1048_s7 + $0xf8] sm:$0xff] }
  0x18   :  { %607 = vmatprep.subr.mxu0 %v58_v24  ;;  %v215_v40 = vld [vmem:[%s1045_s4] sm:$0xf]  ;;  %685 = vmatprep.subr.mxu1 %v723_v4  ;;  %v385_v0 = vld [vmem:[%s1047_s6 + $0x8] sm:$0xff]  ;;  %v477_v6 = vld [vmem:[%s1048_s7 + $0x78] sm:$0xff] }
  0x19   :  { %608 = vmatpush3.msra.mxu0 %v42_v25  ;;  %v33_v41 = vld [vmem:[%s1043_s2] sm:$0xff]  ;;  %686 = vmatpush3.msra.mxu1 %v297_v43  ;;  %v492_v7 = vld [vmem:[%s1048_s7 + $0xf0] sm:$0xff]  ;;  %v491_v9 = vld [vmem:[%s1048_s7 + $0xe8] sm:$0xff] }
  0x1a   :  { %609 = vmatprep.subr.mxu0 %v57_v26  ;;  %687 = vmatprep.subr.mxu1 %v723_v4  ;;  %v295_v45 = vld [vmem:[%s1046_s5] sm:$0xff]  ;;  %v476_v8 = vld [vmem:[%s1048_s7 + $0x70] sm:$0xff]  ;;  %v475_v10 = vld [vmem:[%s1048_s7 + $0x68] sm:$0xff] }
  0x1b   :  { %610 = vmatpush3.msra.mxu0 %v41_v27  ;;  %688 = vmatpush3.msra.mxu1 %v296_v44  ;;  %v384_v1 = vld [vmem:[%s1047_s6] sm:$0xff]  ;;  %v489_v13 = vld [vmem:[%s1048_s7 + $0xd8] sm:$0xff]  ;;  %v488_v16 = vld [vmem:[%s1048_s7 + $0xd0] sm:$0xff]  ;;  %s725_s6 = smov [#allocation2]  }
  0x1c   :  { %611 = vmatprep.subr.mxu0 %v56_v28  ;;  %689 = vmatprep.subr.mxu1 %v723_v4  ;;  %v490_v11 = vld [vmem:[%s1048_s7 + $0xe0] sm:$0xff]  ;;  %v473_v15 = vld [vmem:[%s1048_s7 + $0x58] sm:$0xff]  ;;  %v472_v17 = vld [vmem:[%s1048_s7 + $0x50] sm:$0xff]  ;;  %s572_s1 = sshll.u32 %s725_s6, 4  ;;  %s573_s1 = int_to_ptr.vmem [resolvable:$true] %s572_s1 }
  0x1d   :  { %612 = vmatpush3.msra.mxu0 %v40_v29  ;;  %690 = vmatpush3.msra.mxu1 %v295_v45  ;;  %v474_v12 = vld [vmem:[%s1048_s7 + $0x60] sm:$0xff]  ;;  %v487_v18 = vld [vmem:[%s1048_s7 + $0xc8] sm:$0xff]  ;;  %v485_v22 = vld [vmem:[%s1048_s7 + $0xb8] sm:$0xff]  ;;  %p706_p1 = scmp.lt.s32.totalorder %s573_s1, %s573_s1 }
  0x1e   :  { %613 = vmatprep.subr.mxu0 %v55_v30  ;;  %419 = vmatprep.subr.mxu1 %v385_v0  ;;  %v471_v19 = vld [vmem:[%s1048_s7 + $0x48] sm:$0xff]  ;;  %v486_v20 = vld [vmem:[%s1048_s7 + $0xc0] sm:$0xff]  ;;  %v469_v23 = vld [vmem:[%s1048_s7 + $0x38] sm:$0xff] }
  0x1f   :  { %614 = vmatpush3.msra.mxu0 %v39_v31  ;;  %v470_v21 = vld [vmem:[%s1048_s7 + $0x40] sm:$0xff]  ;;  %v484_v24 = vld [vmem:[%s1048_s7 + $0xb0] sm:$0xff]  ;;  %v483_v26 = vld [vmem:[%s1048_s7 + $0xa8] sm:$0xff] }
  0x20   :  { %615 = vmatprep.subr.mxu0 %v54_v32  ;;  %v468_v25 = vld [vmem:[%s1048_s7 + $0x30] sm:$0xff]  ;;  %v467_v27 = vld [vmem:[%s1048_s7 + $0x28] sm:$0xff]  ;;  %v482_v28 = vld [vmem:[%s1048_s7 + $0xa0] sm:$0xff] }
  0x21   :  { %616 = vmatpush3.msra.mxu0 %v38_v33  ;;  %v466_v29 = vld [vmem:[%s1048_s7 + $0x20] sm:$0xff]  ;;  %v481_v30 = vld [vmem:[%s1048_s7 + $0x98] sm:$0xff]  ;;  %v480_v32 = vld [vmem:[%s1048_s7 + $0x90] sm:$0xff] }
  0x22   :  { %135 = vmatmul.mubr.f32.vlgmr.msra.gmra.mxu0 %v879_v34  ;;  %667 = vmatprep.subr.mxu0 %v723_v4  ;;  %v465_v31 = vld [vmem:[%s1048_s7 + $0x18] sm:$0xff]  ;;  %v464_v33 = vld [vmem:[%s1048_s7 + $0x10] sm:$0xff] }
  0x23   :  { %668 = vmatpush3.msra.mxu0 %v37_v35  ;;  %675 = vmatprep.mubr.msk.f32.mxu0 %vm724_vm0, %v723_v4  ;;  %v479_v35 = vld [vmem:[%s1048_s7 + $0x88] sm:$0xff] }
  0x24   :  { %669 = vmatprep.subr.mxu0 %v723_v4 }
  0x25   :  { %670 = vmatpush3.msra.mxu0 %v36_v36  ;;  %v463_v36 = vld [vmem:[%s1048_s7 + $0x8] sm:$0xff] }
  0x26   :  { %671 = vmatprep.subr.mxu0 %v723_v4 }
  0x27   :  { %672 = vmatpush3.msra.mxu0 %v35_v37  ;;  %v478_v37 = vld [vmem:[%s1048_s7 + $0x80] sm:$0xff] }
  0x28   :  { %673 = vmatprep.subr.mxu0 %v723_v4 }
  0x29   :  { %674 = vmatpush3.msra.mxu0 %v34_v38  ;;  %v462_v38 = vld [vmem:[%s1048_s7] sm:$0xff]  ;;  %s701_s7 = scalar_lea.vmem %s573_s1, 128 }
  0x2a   :  { %676 = vmatmul.mubr.msk.f32.vlgmr.msra.gmra.mxu0 %vm140_vm1, %v30_v39  ;;  %678 = vmatprep.subr.mxu0 %v723_v4  ;;  %p702_p0 = scmp.ne.s32.totalorder %s573_s1, %s701_s7  ;;  %p707_p2 = scmp.lt.s32.totalorder %s701_s7, %s701_s7 }
  0x2b   :  { %679 = vmatpush3.msk.msra.mxu0 %vm220_vm2, %v215_v40  ;;  %680 = vmatprep.mubr.msk.f32.mxu0 %vm724_vm0, %v723_v4 }
  0x2c   :  { %p708_p3 = por %p707_p2, %p706_p1 }
  0x2e   :  { %681 = vmatmul.mubr.msk.f32.vlgmr.msra.gmra.mxu0 %vm216_vm3, %v33_v41  ;;  %p709_p4 = pnand %p708_p3, %p702_p0 }
  0xe2   :  { %v617_v46 = vpop.f32.mrf.mxu0 }
  0xe4   :  { %v618_v47 = vpop.f32.mrf.mxu0 }
  0xe5   :  { %v619_v48 = vadd.f32 %v618_v47, %v617_v46 }
  0xea   :  { %v210_v49 = vpop.f32.mrf.mxu0 }
  0xeb   :  { %v211_v50 = vadd.f32 %v619_v48, %v210_v49 }
  0xec   :  { %v677_v51 = vpop.f32.mrf.mxu0 }
  0xed   :  { %v214_v52 = vmax.f32 %v211_v50, 0.0 }
  0xee   :  { %v290_v53 = vpop.f32.mrf.mxu0 }
  0xef   :  { %v294_v54 = vmul.f32 %v290_v53, %v214_v52 }
  0xf0   :  { %v682_v55 = vpop.f32.mrf.mxu0 }
  0xf1   :  { %692 = vmatmul.mubr.msk.f32.vlgmr.msra.gmra.mxu1 %vm140_vm1, %v294_v54 }
  0xf2   :  { %453 = vmatprep.mubr.f32.mxu1 %v723_v4  ;;  %420 = vmatpush1.msra.mxu1 %v384_v1 }
  0xf3   :  { %632 = vmatprep.subr.mxu1 %v493_v2 }
 0x1b1   :  { %v368_v56 = vpop.f32.mrf.mxu1 }
 0x1b2   :  { %v373_v57 = vsel %vm372_vm4, %v368_v56, -inf }
 0x1b3   :  { %374 = vmax.xlane.f32.xlu0 %v373_v57  ;;  %v693_v58 = vpop.f32.mrf.mxu1 }
 0x23c   :  { %v375_v59 = vpop.xlane.xlu0 %374 }
 0x23d   :  { %v376_v60 = vsub.f32 %v368_v56, %v375_v59 }
 0x23f   :  { %v377_v61 = vmul.f32 1.442695, %v376_v60 }
 0x241   :  { %697 = vpow2.f32 %v377_v61 }
 0x24e   :  { %v698_v62 = vpop.eup %697 }
 0x24f   :  { %v379_v63 = vsel %vm372_vm4, %v698_v62, 0.0 }
 0x250   :  { %380 = vadd.xlane.f32.xlu0 %v379_v63 }
 0x2d9   :  { %v381_v3 = vpop.xlane.xlu0 %380 }
 0x2da   :  { %699 = vrcp.f32 %v381_v3 }
 0x2e7   :  { %v700_v4 = vpop.eup %699 }
 0x2e8   :  { %v383_v5 = vmul.f32 %v700_v4, %v698_v62 }
 0x2ea   :  { %584 = vmatmul.mubr.msk.f32.vlgmr.msra.gmra.mxu1 %vm372_vm4, %v383_v5 }
 0x2eb   :  { %633 = vmatpush3.msra.mxu1 %v477_v6 }
 0x2ec   :  { %634 = vmatprep.subr.mxu1 %v492_v7 }
 0x2ed   :  { %635 = vmatpush3.msra.mxu1 %v476_v8 }
 0x2ee   :  { %636 = vmatprep.subr.mxu1 %v491_v9 }
 0x2ef   :  { %637 = vmatpush3.msra.mxu1 %v475_v10 }
 0x2f0   :  { %638 = vmatprep.subr.mxu1 %v490_v11 }
 0x2f1   :  { %639 = vmatpush3.msra.mxu1 %v474_v12 }
 0x2f2   :  { %640 = vmatprep.subr.mxu1 %v489_v13 }
 0x2f3   :  { %641 = vmatpush3.msra.mxu1 %v473_v15 }
 0x2f4   :  { %642 = vmatprep.subr.mxu1 %v488_v16 }
 0x2f5   :  { %643 = vmatpush3.msra.mxu1 %v472_v17 }
 0x2f6   :  { %644 = vmatprep.subr.mxu1 %v487_v18 }
 0x2f7   :  { %645 = vmatpush3.msra.mxu1 %v471_v19 }
 0x2f8   :  { %646 = vmatprep.subr.mxu1 %v486_v20 }
 0x2f9   :  { %647 = vmatpush3.msra.mxu1 %v470_v21 }
 0x2fa   :  { %648 = vmatprep.subr.mxu1 %v485_v22 }
 0x2fb   :  { %649 = vmatpush3.msra.mxu1 %v469_v23 }
 0x2fc   :  { %650 = vmatprep.subr.mxu1 %v484_v24 }
 0x2fd   :  { %651 = vmatpush3.msra.mxu1 %v468_v25 }
 0x2fe   :  { %652 = vmatprep.subr.mxu1 %v483_v26 }
 0x2ff   :  { %653 = vmatpush3.msra.mxu1 %v467_v27 }
 0x300   :  { %654 = vmatprep.subr.mxu1 %v482_v28 }
 0x301   :  { %655 = vmatpush3.msra.mxu1 %v466_v29 }
 0x302   :  { %656 = vmatprep.subr.mxu1 %v481_v30 }
 0x303   :  { %657 = vmatpush3.msra.mxu1 %v465_v31 }
 0x304   :  { %658 = vmatprep.subr.mxu1 %v480_v32 }
 0x305   :  { %659 = vmatpush3.msra.mxu1 %v464_v33 }
 0x306   :  { %660 = vmatprep.subr.mxu1 %v479_v35 }
 0x307   :  { %661 = vmatpush3.msra.mxu1 %v463_v36 }
 0x308   :  { %662 = vmatprep.subr.mxu1 %v478_v37 }
 0x309   :  { %663 = vmatpush3.msra.mxu1 %v462_v38 }
 0x3aa   :  { %v455_v39 = vpop.f32.mrf.mxu1 }
 0x3ab   :  { %v460_v42 = vmul.f32 %v455_v39, %v879_v34 }
 0x3ac   :  { %v457_v40 = vpop.f32.mrf.mxu1 }
 0x3ad   :  { %v461_v41 = vmul.f32 %v457_v40, %v816_v14 }
 0x3af   :  { %558 = vmatprep.mubr.f32.mxu1 %v461_v41 }
 0x3b0   :  { %559 = vmatmul.mubr.f32.vlgmr.msra.gmra.mxu1 %v460_v42 }
 0x470   :  { %v664_v43 = vpop.f32.mrf.mxu1 }
 0x472   :  { %v665_v44 = vpop.f32.mrf.mxu1 }
 0x473   :  { %v666_v45 = vadd.f32 %v665_v44, %v664_v43 }
 0x475   :  { %v564_v46 = vmax.f32 %v666_v45, 0.0 }
 0x477   :  { %565 = vst.msk [vmem:[#allocation2] sm:$0xff] %vm140_vm1, %v564_v46 }
 0x478   :  { %712 = shalt.err (!%p709_p4)
}
 0x479   :  { %575 = dma.vmem_to_hbm [thread:$0]  %s573_s1, 128, %s1049_s8, [#allocation3]  }
 0x47a   :  { %721 = dma.done.wait [#allocation3], 128  }
 0x47b   :  { %722 = vsyncadd [#allocation3], 4294967168 }
 0x47c   :  { %579 = vsyncpa [#allocation3], 1 }

</bundles_post_ra>
